<compile_context>
chip_gen: v6e
topology: v6e:2x2x1
jax: 0.10.0
libtpu: 0.0.40
codegen_flags: <defaults>
</compile_context>

<pallas_src>
import jax
import jax.numpy as jnp
from jax.experimental import pallas as pl
from jax.experimental.pallas import tpu as pltpu

_LANE = 128
_SUBLANE = 8


def _round_up(v, m):
    return ((v + m - 1) // m) * m


# --------------------------------------------------------------------------
# Kernel: fused fc1 -> ReLU -> fc2 -> softmax on one (batch-on-lanes) tile.
# --------------------------------------------------------------------------
def _policy_kernel(xT_ref, w1T_ref, b1_ref, w2T_ref, b2_ref, out_ref):
    # fc1: h^T (H, tile_b) = W1^T (H, S) @ x^T (S, tile_b); f32 accumulate.
    h = jnp.dot(w1T_ref[...], xT_ref[...], preferred_element_type=jnp.float32)
    h = jnp.maximum(h + b1_ref[...], 0.0)                      # bias + ReLU (VPU)

    # fc2: logits^T (A_pad, tile_b).  Cast h back to the weight dtype so an
    # optional bf16 path feeds the MXU in bf16; bias add stays f32.
    logits = jnp.dot(w2T_ref[...], h.astype(w2T_ref.dtype),
                     preferred_element_type=jnp.float32) + b2_ref[...]

    # Numerically stable softmax over the padded action sublanes (axis 0).
    # Padded rows carry a -1e30 bias (and zero weights) -> exp() == 0 exactly.
    m = jnp.max(logits, axis=0, keepdims=True)
    e = jnp.exp(logits - m)
    denom = jnp.sum(e, axis=0, keepdims=True)
    out_ref[...] = (e / denom).astype(out_ref.dtype)            # exact normalize


# --------------------------------------------------------------------------
# One-time parameter packing (PyTorch nn.Linear convention: weight = (out, in)).
# --------------------------------------------------------------------------
def prepack_params(w1, b1, w2, b2, *, compute_dtype=jnp.float32):
    """Pack fc1/fc2 params for the feature-major kernel.

    w1: (H, S) fc1.weight    b1: (H,) fc1.bias
    w2: (A, H) fc2.weight    b2: (A,) fc2.bias
    Padding/transposes/casts happen here exactly once; the per-step forward
    only touches x.
    """
    H, _S = w1.shape
    A, _H2 = w2.shape
    a_pad = max(_SUBLANE, _round_up(A, _SUBLANE))   # action dim on sublanes

    # Zero weight rows + -1e30 bias for padded actions => they contribute
    # exactly 0 to the softmax.  Biases must stay f32 (never bf16-cast -1e30).
    w2p = jnp.zeros((a_pad, H), w2.dtype).at[:A, :].set(w2)
    b2p = jnp.full((a_pad, 1), -1e30, jnp.float32).at[:A, 0].set(
        b2.astype(jnp.float32))

    return dict(
        w1T=w1.astype(compute_dtype),                         # (H, S)
        b1=b1.astype(jnp.float32).reshape(H, 1),              # (H, 1)
        w2T=w2p.astype(compute_dtype),                        # (a_pad, H)
        b2=b2p,                                               # (a_pad, 1), f32
        action_size=A,
    )


def _choose_tile_b(batch, max_tile_b):
    """Big, lane-aligned batch tiles; >=2 tiles so v7x's two TCs both work."""
    max_tile_b = max(_LANE, _round_up(max_tile_b, _LANE))
    half = _round_up(pl.cdiv(batch, 2), _LANE)     # two ~equal lane-aligned tiles
    return max(_LANE, min(max_tile_b, half))


# --------------------------------------------------------------------------
# Forward wrapper.
# --------------------------------------------------------------------------
def policy_network_forward(x, params, *, max_tile_b=2048, single_block_max=512,
                           out_dtype=jnp.float32):
    """Fused Linear->ReLU->Linear->softmax.

    x: (B, S) states; params from prepack_params().  Returns (B, A) action
    probabilities (rows sum to 1).
    """
    w1T, b1, w2T, b2 = params["w1T"], params["b1"], params["w2T"], params["b2"]
    A = params["action_size"]
    B, S = x.shape
    H = w1T.shape[0]
    a_pad = w2T.shape[0]

    # Batch-on-lanes layout: x^T block (S, tile_b) is lane-dense (vs. a sparse
    # 16-byte-per-row (tile_b, S) block).  x itself is tiny, so this transpose
    # is negligible next to the output write.
    xT = x.astype(w1T.dtype).T                                  # (S, B)

    if B <= single_block_max:
        # Whole problem in one VMEM-resident block: no grid, no pipeline
        # scaffolding.
        probsT = pl.pallas_call(
            _policy_kernel,
            out_shape=jax.ShapeDtypeStruct((a_pad, B), out_dtype),
            in_specs=[pl.BlockSpec(memory_space=pltpu.MemorySpace.VMEM)] * 5,
            out_specs=pl.BlockSpec(memory_space=pltpu.MemorySpace.VMEM),
        )(xT, w1T, b1, w2T, b2)
    else:
        tile_b = _choose_tile_b(B, max_tile_b)
        nb = pl.cdiv(B, tile_b)
        # Ragged last tile is handled by Pallas boundary-block masking: no
        # wrapper-side jnp.pad of x and no post-hoc slice over a padded output.
        probsT = pl.pallas_call(
            _policy_kernel,
            out_shape=jax.ShapeDtypeStruct((a_pad, B), out_dtype),
            grid=(nb,),
            in_specs=[
                pl.BlockSpec((S, tile_b), lambda i: (0, i)),     # x^T tile
                pl.BlockSpec((H, S), lambda i: (0, 0)),          # W1^T (resident)
                pl.BlockSpec((H, 1), lambda i: (0, 0)),          # b1   (resident)
                pl.BlockSpec((a_pad, H), lambda i: (0, 0)),      # W2^T (resident)
                pl.BlockSpec((a_pad, 1), lambda i: (0, 0)),      # b2   (resident)
            ],
            out_specs=pl.BlockSpec((a_pad, tile_b), lambda i: (0, i)),
            compiler_params=pltpu.CompilerParams(
                dimension_semantics=("parallel",)),
        )(xT, w1T, b1, w2T, b2)

    # Tiny epilogue: drop padded action rows, put batch back on axis 0.
    # (Only A*B elements -- e.g. 2*B -- not the old (B, 128) padded slab.)
    return probsT[:A, :].T


# --------------------------------------------------------------------------
# Self-test
# --------------------------------------------------------------------------
if __name__ == "__main__":
    # CartPole-like shapes: state_size=4, hidden=128, actions=2.
    state_size, action_size, hidden_size = 4, 2, 128

    key = jax.random.PRNGKey(0)
    kx1, kx2, kp = jax.random.split(key, 3)

    # PyTorch nn.Linear default init: U(-1/sqrt(fan_in), 1/sqrt(fan_in)),
    # weights in (out, in) convention.
    k1, k2, k3, k4 = jax.random.split(kp, 4)
    lim1 = 1.0 / jnp.sqrt(jnp.float32(state_size))
    lim2 = 1.0 / jnp.sqrt(jnp.float32(hidden_size))
    w1 = jax.random.uniform(k1, (hidden_size, state_size), jnp.float32, -lim1, lim1)
    b1 = jax.random.uniform(k2, (hidden_size,), jnp.float32, -lim1, lim1)
    w2 = jax.random.uniform(k3, (action_size, hidden_size), jnp.float32, -lim2, lim2)
    b2 = jax.random.uniform(k4, (action_size,), jnp.float32, -lim2, lim2)

    params = prepack_params(w1, b1, w2, b2)   # one-time prepack (not per step)

    def ref_forward(x):
        h = jnp.maximum(x @ w1.T + b1, 0.0)
        return jax.nn.softmax(h @ w2.T + b2, axis=-1)

    # (1) small batch -> single VMEM-resident block (no grid)
    x_small = jax.random.normal(kx1, (64, state_size), jnp.float32)
    out_small = jax.block_until_ready(policy_network_forward(x_small, params))
    assert out_small.shape == (64, action_size)
    assert jnp.allclose(out_small, ref_forward(x_small), atol=2e-3, rtol=2e-3)
    assert jnp.allclose(jnp.sum(out_small, axis=-1), 1.0, atol=1e-5)

    # (2) larger ragged batch -> two lane-aligned "parallel" tiles (384 + 216)
    x_big = jax.random.normal(kx2, (600, state_size), jnp.float32)
    out_big = jax.block_until_ready(policy_network_forward(x_big, params))
    assert out_big.shape == (600, action_size)
    assert jnp.allclose(out_big, ref_forward(x_big), atol=2e-3, rtol=2e-3)
    assert jnp.allclose(jnp.sum(out_big, axis=-1), 1.0, atol=1e-5)

    print("KERNEL_OK")
</pallas_src>

<mosaic_0001>
module attributes {stable_mosaic.version = 11 : i64} {
  func.func @_policy_kernel(%arg0: memref<4x64xf32, #tpu.memory_space<vmem>>, %arg1: memref<128x4xf32, #tpu.memory_space<vmem>>, %arg2: memref<128x1xf32, #tpu.memory_space<vmem>>, %arg3: memref<8x128xf32, #tpu.memory_space<vmem>>, %arg4: memref<8x1xf32, #tpu.memory_space<vmem>>, %arg5: memref<8x64xf32, #tpu.memory_space<vmem>>) attributes {dimension_semantics = [], scalar_prefetch = 0 : i64, scratch_operands = 0 : i64, tpu.core_type = #tpu.core_type<tc>} {
    %c0 = arith.constant 0 : index
    %c0_0 = arith.constant 0 : index
    %0 = vector.load %arg1[%c0, %c0_0] : memref<128x4xf32, #tpu.memory_space<vmem>>, vector<128x4xf32>
    %c0_1 = arith.constant 0 : index
    %c0_2 = arith.constant 0 : index
    %1 = vector.load %arg0[%c0_1, %c0_2] : memref<4x64xf32, #tpu.memory_space<vmem>>, vector<4x64xf32>
    %cst = arith.constant dense<0.000000e+00> : vector<128x64xf32>
    %2 = tpu.matmul %0, %1, %cst {dimension_numbers = #tpu.dot_dimension_numbers<[1], [0], [0], [1], [0, 0, 1, 1], [], []>} : vector<128x4xf32>, vector<4x64xf32>, vector<128x64xf32> -> vector<128x64xf32>
    %c0_3 = arith.constant 0 : index
    %c0_4 = arith.constant 0 : index
    %3 = vector.load %arg2[%c0_3, %c0_4] : memref<128x1xf32, #tpu.memory_space<vmem>>, vector<128x1xf32>
    %4 = vector.broadcast %3 : vector<128x1xf32> to vector<128x64xf32>
    %5 = arith.addf %2, %4 : vector<128x64xf32>
    %cst_5 = arith.constant 0.000000e+00 : f32
    %6 = vector.broadcast %cst_5 : f32 to vector<128x64xf32>
    %7 = arith.maximumf %5, %6 : vector<128x64xf32>
    %c0_6 = arith.constant 0 : index
    %c0_7 = arith.constant 0 : index
    %8 = vector.load %arg3[%c0_6, %c0_7] : memref<8x128xf32, #tpu.memory_space<vmem>>, vector<8x128xf32>
    %cst_8 = arith.constant dense<0.000000e+00> : vector<8x64xf32>
    %9 = tpu.matmul %8, %7, %cst_8 {dimension_numbers = #tpu.dot_dimension_numbers<[1], [0], [0], [1], [0, 0, 1, 1], [], []>} : vector<8x128xf32>, vector<128x64xf32>, vector<8x64xf32> -> vector<8x64xf32>
    %c0_9 = arith.constant 0 : index
    %c0_10 = arith.constant 0 : index
    %10 = vector.load %arg4[%c0_9, %c0_10] : memref<8x1xf32, #tpu.memory_space<vmem>>, vector<8x1xf32>
    %11 = vector.broadcast %10 : vector<8x1xf32> to vector<8x64xf32>
    %12 = arith.addf %9, %11 : vector<8x64xf32>
    %cst_11 = arith.constant dense<0xFF800000> : vector<64xf32>
    %13 = vector.multi_reduction <maximumf>, %12, %cst_11 [0] : vector<8x64xf32> to vector<64xf32>
    %14 = vector.shape_cast %13 : vector<64xf32> to vector<1x64xf32>
    %15 = vector.broadcast %14 : vector<1x64xf32> to vector<8x64xf32>
    %16 = arith.subf %12, %15 : vector<8x64xf32>
    %17 = math.exp %16 : vector<8x64xf32>
    %cst_12 = arith.constant dense<0.000000e+00> : vector<64xf32>
    %18 = vector.multi_reduction <add>, %17, %cst_12 [0] : vector<8x64xf32> to vector<64xf32>
    %19 = vector.shape_cast %18 : vector<64xf32> to vector<1x64xf32>
    %20 = vector.broadcast %19 : vector<1x64xf32> to vector<8x64xf32>
    %21 = arith.divf %17, %20 : vector<8x64xf32>
    %c0_13 = arith.constant 0 : index
    %c0_14 = arith.constant 0 : index
    %22 = vector.load %arg5[%c0_13, %c0_14] : memref<8x64xf32, #tpu.memory_space<vmem>>, vector<8x64xf32>
    tpu.vector_store %arg5[%c0_13, %c0_14], %21 {strides = array<i32>} : memref<8x64xf32, #tpu.memory_space<vmem>>, vector<8x64xf32>,
    return
  }
}

</mosaic_0001>

<bundles_post_ra>
// kernel: tpu_custom_call.1
= control target key start
LH: loop header
LB: loop body
LE: loop exit
PB: predicated region body
PF: predicated region fallthrough
CT: control target
= control target key end

     0   :  { %vm183_vm0 = vcmask 1043456   ;;  %vm134_vm1 = vcmask 31744   ;;  %v604_v4 = vmov 0   ;;  %s794_s0 = inlined_call_operand.vmem [shape: f32[4,64], index: 0, kind: input, shape index: {}]   ;;  %s795_s1 = inlined_call_operand.vmem [shape: f32[128,4], index: 1, kind: input, shape index: {}]   ;;  %s796_s2 = inlined_call_operand.vmem [shape: f32[128,1], index: 2, kind: input, shape index: {}]   ;;  %s797_s3 = inlined_call_operand.vmem [shape: f32[8,128], index: 3, kind: input, shape index: {}]   ;;  %s798_s4 = inlined_call_operand.vmem [shape: f32[8,1], index: 4, kind: input, shape index: {}]   ;;  %s799_s5 = inlined_call_operand.hbm [shape: f32[8,64], index: 5, kind: output, shape index: {}]  }
   0x1   :  { %v37_v0 = vld [vmem:[%s794_s0] sm:$0xf]  ;;  %v22_v2 = vld [vmem:[%s795_s1 + $0x8] sm:$0xff]  ;;  %v23_v3 = vld [vmem:[%s795_s1 + $0x10] sm:$0xff]  ;;  %576 = vset.pattern.permute.xlu0 %v604_v4  ;;  %577 = vset.pattern.permute.xlu1 %v604_v4 }
   0x2   :  { %v21_v1 = vld [vmem:[%s795_s1] sm:$0xff]  ;;  %511 = vmatprep.subr.msk.mxu0 %vm183_vm0, %v37_v0  ;;  %v24_v5 = vld [vmem:[%s795_s1 + $0x18] sm:$0xff]  ;;  %v51_v8 = vld [vmem:[%s796_s2 + $0x68] sm:$0xff] }
   0x3   :  { %513 = vmatprep.mubr.msk.f32.mxu0 %vm134_vm1, %v21_v1  ;;  %512 = vmatpush3.msk.msra.mxu0 %vm183_vm0, %v37_v0  ;;  %v25_v6 = vld [vmem:[%s795_s1 + $0x20] sm:$0xff]  ;;  %v53_v7 = vld [vmem:[%s796_s2 + $0x78] sm:$0xff]  ;;  %v52_v9 = vld [vmem:[%s796_s2 + $0x70] sm:$0xff] }
   0x4   :  { %514 = vmatmul.mubr.msk.f32.vlgmr.msra.gmra.mxu0 %vm134_vm1, %v22_v2  ;;  %131 = vperm.xlu0 %576, %v53_v7   ;;  %v26_v10 = vld [vmem:[%s795_s1 + $0x28] sm:$0xff]  ;;  %v50_v11 = vld [vmem:[%s796_s2 + $0x60] sm:$0xff]  ;;  %v27_v12 = vld [vmem:[%s795_s1 + $0x30] sm:$0xff] }
   0x5   :  { %516 = vmatprep.mubr.msk.f32.mxu0 %vm134_vm1, %v23_v3  ;;  %121 = vperm.xlu1 %577, %v51_v8   ;;  %v49_v13 = vld [vmem:[%s796_s2 + $0x58] sm:$0xff] }
   0x8   :  { %517 = vmatmul.mubr.msk.f32.gmra.mxu0 %vm134_vm1, %v24_v5  ;;  %126 = vperm.xlu0 %576, %v52_v9  }
   0x9   :  { %519 = vmatprep.mubr.msk.f32.mxu0 %vm134_vm1, %v25_v6  ;;  %116 = vperm.xlu1 %577, %v50_v11  }
   0xc   :  { %520 = vmatmul.mubr.msk.f32.gmra.mxu0 %vm134_vm1, %v26_v10 }
   0xd   :  { %10 = vsyncpa [#allocation3], 0  ;;  %522 = vmatprep.mubr.msk.f32.mxu0 %vm134_vm1, %v27_v12  ;;  %v28_v14 = vld [vmem:[%s795_s1 + $0x38] sm:$0xff]  ;;  %v48_v15 = vld [vmem:[%s796_s2 + $0x50] sm:$0xff]  ;;  %111 = vperm.xlu0 %576, %v49_v13   ;;  %v605_v35 = vmov 0.0   ;;  %vm606_vm2 = vmmov 0  }
   0xe   :  { %v29_v16 = vld [vmem:[%s795_s1 + $0x40] sm:$0xff]  ;;  %106 = vperm.xlu1 %577, %v48_v15   ;;  %v47_v17 = vld [vmem:[%s796_s2 + $0x48] sm:$0xff]  ;;  %v31_v20 = vld [vmem:[%s795_s1 + $0x50] sm:$0xff]  ;;  %537 = vmatprep.subr.mxu1 %v605_v35  ;;  %vm425_vm3 = vcmask 523264  }
   0xf   :  { %v30_v18 = vld [vmem:[%s795_s1 + $0x48] sm:$0xff]  ;;  %v46_v19 = vld [vmem:[%s796_s2 + $0x40] sm:$0xff]  ;;  %v45_v21 = vld [vmem:[%s796_s2 + $0x38] sm:$0xff]  ;;  %569 = vmatprep.mubr.msk.f32.mxu1 %vm606_vm2, %v605_v35 }
  0x10   :  { %523 = vmatmul.mubr.msk.f32.gmra.mxu0 %vm134_vm1, %v28_v14  ;;  %v32_v22 = vld [vmem:[%s795_s1 + $0x58] sm:$0xff]  ;;  %v44_v23 = vld [vmem:[%s796_s2 + $0x30] sm:$0xff]  ;;  %v33_v24 = vld [vmem:[%s795_s1 + $0x60] sm:$0xff] }
  0x11   :  { %525 = vmatprep.mubr.msk.f32.mxu0 %vm134_vm1, %v29_v16  ;;  %101 = vperm.xlu0 %576, %v47_v17   ;;  %v43_v25 = vld [vmem:[%s796_s2 + $0x28] sm:$0xff]  ;;  %v42_v27 = vld [vmem:[%s796_s2 + $0x20] sm:$0xff]  ;;  %v35_v28 = vld [vmem:[%s795_s1 + $0x70] sm:$0xff] }
  0x12   :  { %96 = vperm.xlu1 %577, %v46_v19   ;;  %v34_v26 = vld [vmem:[%s795_s1 + $0x68] sm:$0xff]  ;;  %v41_v29 = vld [vmem:[%s796_s2 + $0x18] sm:$0xff]  ;;  %v40_v31 = vld [vmem:[%s796_s2 + $0x10] sm:$0xff] }
  0x13   :  { %v36_v30 = vld [vmem:[%s795_s1 + $0x78] sm:$0xff]  ;;  %v39_v32 = vld [vmem:[%s796_s2 + $0x8] sm:$0xff]  ;;  %v38_v33 = vld [vmem:[%s796_s2] sm:$0xff] }
  0x14   :  { %526 = vmatmul.mubr.msk.f32.gmra.mxu0 %vm134_vm1, %v30_v18  ;;  %v349_v34 = vld [vmem:[%s798_s4] sm:$0xff] }
  0x15   :  { %528 = vmatprep.mubr.msk.f32.mxu0 %vm134_vm1, %v31_v20  ;;  %91 = vperm.xlu0 %576, %v45_v21  }
  0x16   :  { %86 = vperm.xlu1 %577, %v44_v23  }
  0x18   :  { %529 = vmatmul.mubr.msk.f32.gmra.mxu0 %vm134_vm1, %v32_v22 }
  0x19   :  { %531 = vmatprep.mubr.msk.f32.mxu0 %vm134_vm1, %v33_v24  ;;  %81 = vperm.xlu0 %576, %v43_v25  }
  0x1a   :  { %76 = vperm.xlu1 %577, %v42_v27  }
  0x1c   :  { %532 = vmatmul.mubr.msk.f32.gmra.mxu0 %vm134_vm1, %v34_v26 }
  0x1d   :  { %534 = vmatprep.mubr.msk.f32.mxu0 %vm134_vm1, %v35_v28  ;;  %71 = vperm.xlu0 %576, %v41_v29  }
  0x1e   :  { %66 = vperm.xlu1 %577, %v40_v31  }
  0x20   :  { %535 = vmatmul.mubr.msk.f32.gmra.mxu0 %vm134_vm1, %v36_v30 }
  0x21   :  { %61 = vperm.xlu0 %576, %v39_v32  }
  0x22   :  { %56 = vperm.xlu1 %577, %v38_v33  }
  0x25   :  { %352 = vperm.xlu0 %576, %v349_v34  }
  0x7f   :  { %v132_v41 = vpop.permute.xlu0 %131 }
  0x80   :  { %v122_v43 = vpop.permute.xlu1 %121 }
  0x83   :  { %v127_v46 = vpop.permute.xlu0 %126 }
  0x84   :  { %v117_v48 = vpop.permute.xlu1 %116 }
  0x88   :  { %v112_v51 = vpop.permute.xlu0 %111 }
  0x89   :  { %v107_v53 = vpop.permute.xlu1 %106 }
  0x8c   :  { %v102_v56 = vpop.permute.xlu0 %101 }
  0x8d   :  { %v97_v59 = vpop.permute.xlu1 %96 }
  0x90   :  { %v92_v2 = vpop.permute.xlu0 %91 }
  0x91   :  { %v87_v5 = vpop.permute.xlu1 %86 }
  0x94   :  { %v82_v10 = vpop.permute.xlu0 %81 }
  0x95   :  { %v77_v13 = vpop.permute.xlu1 %76 }
  0x98   :  { %v72_v18 = vpop.permute.xlu0 %71 }
  0x99   :  { %v67_v21 = vpop.permute.xlu1 %66 }
  0x9c   :  { %v62_v26 = vpop.permute.xlu0 %61 }
  0x9d   :  { %v57_v29 = vpop.permute.xlu1 %56 }
  0xc4   :  { %v758_v36 = vpop.f32.mrf.mxu0 }
  0xc5   :  { %v259_v30 = vadd.f32 %v758_v36, %v62_v26  ;;  %v348_v36 = vld [vmem:[%s797_s3] sm:$0xff]  ;;  %s607_s3 = smov [#allocation2]  }
  0xc6   :  { %v760_v37 = vpop.f32.mrf.mxu0  ;;  %s452_s7 = sshll.u32 %s607_s3, 4  ;;  %s453_s7 = int_to_ptr.vmem [resolvable:$true] %s452_s7 }
  0xc7   :  { %v254_v32 = vadd.f32 %v760_v37, %v57_v29  ;;  %v333_v34 = vmax.f32 %v259_v30, 0.0  ;;  %s582_s8 = scalar_lea.vmem %s453_s7, 128  ;;  %p587_p1 = scmp.lt.s32.totalorder %s453_s7, %s453_s7 }
  0xc8   :  { %v762_v38 = vpop.f32.mrf.mxu0  ;;  %p583_p0 = scmp.ne.s32.totalorder %s453_s7, %s582_s8  ;;  %p588_p2 = scmp.lt.s32.totalorder %s582_s8, %s582_s8 }
  0xc9   :  { %v269_v24 = vadd.f32 %v762_v38, %v72_v18  ;;  %v332_v38 = vmax.f32 %v254_v32, 0.0 }
  0xca   :  { %v764_v39 = vpop.f32.mrf.mxu0  ;;  %p589_p3 = por %p588_p2, %p587_p1 }
  0xcb   :  { %v264_v27 = vadd.f32 %v764_v39, %v67_v21  ;;  %v335_v31 = vmax.f32 %v269_v24, 0.0  ;;  %v353_v39 = vpop.permute.xlu0 %352 }
  0xcc   :  { %v521_v40 = vpop.f32.mrf.mxu0  ;;  %p590_p4 = pnand %p589_p3, %p583_p0 }
  0xcd   :  { %v279_v19 = vadd.f32 %v521_v40, %v82_v10  ;;  %v334_v33 = vmax.f32 %v264_v27, 0.0 }
  0xce   :  { %v273_v42 = vpop.f32.mrf.mxu0 }
  0xcf   :  { %v274_v22 = vadd.f32 %v273_v42, %v77_v13  ;;  %v337_v25 = vmax.f32 %v279_v19, 0.0 }
  0xd0   :  { %v524_v44 = vpop.f32.mrf.mxu0 }
  0xd1   :  { %v289_v14 = vadd.f32 %v524_v44, %v92_v2  ;;  %v336_v28 = vmax.f32 %v274_v22, 0.0 }
  0xd2   :  { %v283_v45 = vpop.f32.mrf.mxu0 }
  0xd3   :  { %v284_v16 = vadd.f32 %v283_v45, %v87_v5  ;;  %v339_v20 = vmax.f32 %v289_v14, 0.0 }
  0xd4   :  { %v527_v47 = vpop.f32.mrf.mxu0 }
  0xd5   :  { %v299_v8 = vadd.f32 %v527_v47, %v102_v56  ;;  %v338_v23 = vmax.f32 %v284_v16, 0.0 }
  0xd6   :  { %v293_v49 = vpop.f32.mrf.mxu0 }
  0xd7   :  { %v294_v11 = vadd.f32 %v293_v49, %v97_v59  ;;  %v341_v15 = vmax.f32 %v299_v8, 0.0 }
  0xd8   :  { %v530_v50 = vpop.f32.mrf.mxu0 }
  0xd9   :  { %v309_v3 = vadd.f32 %v530_v50, %v112_v51  ;;  %v340_v17 = vmax.f32 %v294_v11, 0.0 }
  0xda   :  { %v303_v52 = vpop.f32.mrf.mxu0 }
  0xdb   :  { %v304_v6 = vadd.f32 %v303_v52, %v107_v53  ;;  %v343_v9 = vmax.f32 %v309_v3, 0.0 }
  0xdc   :  { %v533_v54 = vpop.f32.mrf.mxu0 }
  0xdd   :  { %v319_v61 = vadd.f32 %v533_v54, %v122_v43  ;;  %v342_v12 = vmax.f32 %v304_v6, 0.0 }
  0xde   :  { %v313_v55 = vpop.f32.mrf.mxu0 }
  0xdf   :  { %v314_v0 = vadd.f32 %v313_v55, %v117_v48  ;;  %v345_v4 = vmax.f32 %v319_v61, 0.0 }
  0xe0   :  { %v536_v57 = vpop.f32.mrf.mxu0 }
  0xe1   :  { %v329_v58 = vadd.f32 %v536_v57, %v132_v41  ;;  %v344_v7 = vmax.f32 %v314_v0, 0.0 }
  0xe2   :  { %v323_v60 = vpop.f32.mrf.mxu0 }
  0xe3   :  { %v347_v62 = vmax.f32 %v329_v58, 0.0  ;;  %v324_v63 = vadd.f32 %v323_v60, %v127_v46 }
  0xe5   :  { %v346_v1 = vmax.f32 %v324_v63, 0.0  ;;  %538 = vmatpush3.msra.mxu1 %v347_v62 }
  0xe6   :  { %539 = vmatprep.subr.mxu1 %v605_v35 }
  0xe7   :  { %540 = vmatpush3.msra.mxu1 %v346_v1 }
  0xe8   :  { %541 = vmatprep.subr.mxu1 %v605_v35 }
  0xe9   :  { %542 = vmatpush3.msra.mxu1 %v345_v4 }
  0xea   :  { %543 = vmatprep.subr.mxu1 %v605_v35 }
  0xeb   :  { %544 = vmatpush3.msra.mxu1 %v344_v7 }
  0xec   :  { %545 = vmatprep.subr.mxu1 %v605_v35 }
  0xed   :  { %546 = vmatpush3.msra.mxu1 %v343_v9 }
  0xee   :  { %547 = vmatprep.subr.mxu1 %v605_v35 }
  0xef   :  { %548 = vmatpush3.msra.mxu1 %v342_v12 }
  0xf0   :  { %549 = vmatprep.subr.mxu1 %v605_v35 }
  0xf1   :  { %550 = vmatpush3.msra.mxu1 %v341_v15 }
  0xf2   :  { %551 = vmatprep.subr.mxu1 %v605_v35 }
  0xf3   :  { %552 = vmatpush3.msra.mxu1 %v340_v17 }
  0xf4   :  { %553 = vmatprep.subr.mxu1 %v605_v35 }
  0xf5   :  { %554 = vmatpush3.msra.mxu1 %v339_v20 }
  0xf6   :  { %555 = vmatprep.subr.mxu1 %v605_v35 }
  0xf7   :  { %556 = vmatpush3.msra.mxu1 %v338_v23 }
  0xf8   :  { %557 = vmatprep.subr.mxu1 %v605_v35 }
  0xf9   :  { %558 = vmatpush3.msra.mxu1 %v337_v25 }
  0xfa   :  { %559 = vmatprep.subr.mxu1 %v605_v35 }
  0xfb   :  { %560 = vmatpush3.msra.mxu1 %v336_v28 }
  0xfc   :  { %561 = vmatprep.subr.mxu1 %v605_v35 }
  0xfd   :  { %562 = vmatpush3.msra.mxu1 %v335_v31 }
  0xfe   :  { %563 = vmatprep.subr.mxu1 %v605_v35 }
  0xff   :  { %564 = vmatpush3.msra.mxu1 %v334_v33 }
 0x100   :  { %565 = vmatprep.subr.mxu1 %v605_v35 }
 0x101   :  { %566 = vmatpush3.msra.mxu1 %v333_v34 }
 0x102   :  { %567 = vmatprep.subr.mxu1 %v605_v35 }
 0x103   :  { %568 = vmatpush3.msra.mxu1 %v332_v38 }
 0x104   :  { %570 = vmatmul.mubr.f32.vlgmr.msra.gmra.mxu1 %v348_v36 }
 0x1c4   :  { %v421_v37 = vpop.f32.mrf.mxu1 }
 0x1c5   :  { %v422_v40 = vadd.f32 %v421_v37, %v353_v39 }
 0x1c6   :  { %v571_v41 = vpop.f32.mrf.mxu1 }
 0x1c7   :  { %v426_v42 = vsel %vm425_vm3, %v422_v40, -inf }
 0x1c8   :  { %v427_v43 = vrot.slane %v426_v42, 4 }
 0x1ca   :  { %v428_v44 = vmax.f32 %v426_v42, %v427_v43 }
 0x1cc   :  { %v429_v45 = vrot.slane %v428_v44, 2 }
 0x1ce   :  { %v430_v46 = vmax.f32 %v428_v44, %v429_v45 }
 0x1d0   :  { %v431_v47 = vrot.slane %v430_v46, 1 }
 0x1d2   :  { %v432_v48 = vmax.f32 %v430_v46, %v431_v47 }
 0x1d4   :  { %v433_v49 = vsub.f32 %v422_v40, %v432_v48 }
 0x1d6   :  { %v434_v50 = vmul.f32 1.442695, %v433_v49 }
 0x1d8   :  { %578 = vpow2.f32 %v434_v50 }
 0x1e5   :  { %v579_v51 = vpop.eup %578 }
 0x1e6   :  { %v436_v35 = vsel %vm425_vm3, %v579_v51, 0.0 }
 0x1e7   :  { %v437_v52 = vrot.slane %v436_v35, 4 }
 0x1e9   :  { %v438_v53 = vadd.f32 %v437_v52, %v436_v35 }
 0x1eb   :  { %v439_v54 = vrot.slane %v438_v53, 2 }
 0x1ed   :  { %v440_v55 = vadd.f32 %v439_v54, %v438_v53 }
 0x1ef   :  { %v441_v56 = vrot.slane %v440_v55, 1 }
 0x1f1   :  { %v442_v57 = vadd.f32 %v441_v56, %v440_v55 }
 0x1f3   :  { %580 = vrcp.f32 %v442_v57 }
 0x200   :  { %v581_v58 = vpop.eup %580 }
 0x201   :  { %v444_v59 = vmul.f32 %v581_v58, %v579_v51 }
 0x203   :  { %445 = vst.msk [vmem:[#allocation2] sm:$0xff] %vm425_vm3, %v444_v59 }
 0x204   :  { %593 = shalt.err (!%p590_p4)
}
 0x205   :  { %455 = dma.vmem_to_hbm [thread:$0]  %s453_s7, 128, %s799_s5, [#allocation3]  }
 0x206   :  { %602 = dma.done.wait [#allocation3], 128  }
 0x207   :  { %603 = vsyncadd [#allocation3], 4294967168 }
 0x208   :  { %459 = vsyncpa [#allocation3], 1 }

</bundles_post_ra>
